<compile_context>
chip_gen: v7x
topology: tpu7x:2x2x1
jax: 0.10.0
libtpu: 0.0.40
codegen_flags: <defaults>
</compile_context>

<pallas_src>
import functools

import jax
import jax.numpy as jnp
from jax.experimental import pallas as pl
from jax.experimental.pallas import tpu as pltpu


# ----------------------------------------------------------------------------
# helpers
# ----------------------------------------------------------------------------

def _round_up(x, m):
    return (x + m - 1) // m * m


def _tile(dim, pref, granule=128):
    """Largest multiple-of-`granule` tile <= pref that evenly divides dim.
    Model dims are assumed 128-aligned; the token dim is padded by the caller,
    so the full-dim fallback only triggers for small/full dimensions."""
    if dim <= pref:
        return dim
    t = (pref // granule) * granule
    while t >= granule:
        if dim % t == 0:
            return t
        t -= granule
    return dim


@functools.lru_cache(maxsize=None)
def _hw():
    """Per-generation knobs: scoped-VMEM limit and tile preferences."""
    try:
        vmem_cap = pltpu.get_tpu_info().vmem_capacity_bytes
    except Exception:
        vmem_cap = 64 * 1024 * 1024          # conservative default (v7x physical VMEM)
    small_vmem = vmem_cap <= 64 * 1024 * 1024
    return dict(
        vmem_limit=int(min(vmem_cap * 3 // 4, 100 * 1024 * 1024)),
        tn=128 if small_vmem else 256,       # output tile width for generic matmuls
        ti=256 if small_vmem else 512,       # intermediate-dim tile for MLP / MoE
    )


def _cparams(*sem):
    return pltpu.CompilerParams(dimension_semantics=sem,
                                vmem_limit_bytes=_hw()["vmem_limit"])


def _rotate_half(x, half):
    """Neox rotate-half ([x2, x1]); XLU roll on lane-width heads, slice+concat
    fallback for narrow (< 128 lane) head dims. The -/+ sign is folded into sin."""
    if x.shape[-1] >= 128:
        return pltpu.roll(x, half, axis=x.ndim - 1)
    return jnp.concatenate([x[..., half:], x[..., :half]], axis=-1)


# ----------------------------------------------------------------------------
# Generic tiled K-pipelined matmul (bf16 MXU operands, f32 accumulation)
# ----------------------------------------------------------------------------

def _matmul_kernel(x_ref, w_ref, o_ref, acc_ref):
    @pl.when(pl.program_id(2) == 0)
    def _():
        acc_ref[...] = jnp.zeros_like(acc_ref)
    acc_ref[...] += jnp.dot(x_ref[...], w_ref[...],
                            preferred_element_type=jnp.float32)
    @pl.when(pl.program_id(2) == pl.num_programs(2) - 1)
    def _():
        o_ref[...] = acc_ref[...].astype(o_ref.dtype)


def linear(x, w, out_dtype=jnp.bfloat16, tm=256, tn=None, tk=512):
    """y = x @ w ;  x:(M,K) w:(K,N) -> (M,N)."""
    M, K = x.shape
    K2, N = w.shape
    assert K == K2
    tn = _hw()["tn"] if tn is None else tn
    tm, tn, tk = _tile(M, tm, 8), _tile(N, tn), _tile(K, tk)
    return pl.pallas_call(
        _matmul_kernel,
        grid=(M // tm, N // tn, K // tk),
        in_specs=[pl.BlockSpec((tm, tk), lambda i, j, k: (i, k)),
                  pl.BlockSpec((tk, tn), lambda i, j, k: (k, j))],
        out_specs=pl.BlockSpec((tm, tn), lambda i, j, k: (i, j)),
        out_shape=jax.ShapeDtypeStruct((M, N), out_dtype),
        scratch_shapes=[pltpu.VMEM((tm, tn), jnp.float32)],
        compiler_params=_cparams("parallel", "parallel", "arbitrary"),
    )(x.astype(jnp.bfloat16), w.astype(jnp.bfloat16))


# ----------------------------------------------------------------------------
# Fused residual-add + RMSNorm prologue + matmul (used for qkv projection)
# ----------------------------------------------------------------------------

def _add_norm_matmul_kernel(x_ref, res_ref, g_ref, w_ref,
                            y_ref, res_out_ref, xn_ref, *, eps):
    @pl.when(pl.program_id(1) == 0)
    def _():
        s = x_ref[...].astype(jnp.float32) + res_ref[...].astype(jnp.float32)
        res_out_ref[...] = s
        var = jnp.mean(s * s, axis=-1, keepdims=True)
        xn_ref[...] = (s * jax.lax.rsqrt(var + eps) * g_ref[...]).astype(xn_ref.dtype)
    y_ref[...] = jnp.dot(xn_ref[...], w_ref[...],
                         preferred_element_type=jnp.float32).astype(y_ref.dtype)


def add_rmsnorm_matmul(x, residual, gamma, w, eps, tm=256, tn=None):
    """s = x + residual ; y = rmsnorm(s)*gamma @ w.  Returns (y bf16, s f32)."""
    M, H = x.shape
    H2, N = w.shape
    assert H == H2 and residual.shape == (M, H)
    tn = _hw()["tn"] if tn is None else tn
    tm, tn = _tile(M, tm, 8), _tile(N, tn)
    return pl.pallas_call(
        functools.partial(_add_norm_matmul_kernel, eps=eps),
        grid=(M // tm, N // tn),
        in_specs=[pl.BlockSpec((tm, H), lambda i, j: (i, 0)),
                  pl.BlockSpec((tm, H), lambda i, j: (i, 0)),
                  pl.BlockSpec((1, H), lambda i, j: (0, 0)),
                  pl.BlockSpec((H, tn), lambda i, j: (0, j))],
        out_specs=[pl.BlockSpec((tm, tn), lambda i, j: (i, j)),
                   pl.BlockSpec((tm, H), lambda i, j: (i, 0))],
        out_shape=[jax.ShapeDtypeStruct((M, N), jnp.bfloat16),
                   jax.ShapeDtypeStruct((M, H), jnp.float32)],
        scratch_shapes=[pltpu.VMEM((tm, H), jnp.bfloat16)],
        compiler_params=_cparams("parallel", "arbitrary"),
    )(x.astype(jnp.bfloat16), residual,
      gamma.reshape(1, H).astype(jnp.float32), w.astype(jnp.bfloat16))


# ----------------------------------------------------------------------------
# Fused per-head q/k RMSNorm + Neox RoPE + head-major transpose (+ v passthrough)
# ----------------------------------------------------------------------------

def _qkv_prep_kernel(qkv_ref, qg_ref, kg_ref, cos_ref, sin_ref,
                     qo_ref, ko_ref, vo_ref, *, eps, nh, nkv, D):
    half = D // 2
    q_size, kv_size = nh * D, nkv * D
    qkv = qkv_ref[...]                               # (tt, q+2kv) bf16
    cos = cos_ref[...].astype(jnp.float32)           # (tt, D)
    sin = sin_ref[...].astype(jnp.float32)           # (tt, D), rotate-half sign folded in
    qg = qg_ref[...].astype(jnp.float32)             # (1, D)
    kg = kg_ref[...].astype(jnp.float32)

    def norm_rope(x2d, g):
        xf = x2d.astype(jnp.float32)
        var = jnp.mean(xf * xf, axis=-1, keepdims=True)
        xf = xf * jax.lax.rsqrt(var + eps) * g
        return xf * cos + _rotate_half(xf, half) * sin

    for h in range(nh):
        qo_ref[h] = norm_rope(qkv[:, h * D:(h + 1) * D], qg).astype(qo_ref.dtype)
    for h in range(nkv):
        ko_ref[h] = norm_rope(qkv[:, q_size + h * D:q_size + (h + 1) * D],
                              kg).astype(ko_ref.dtype)
        base = q_size + kv_size + h * D
        vo_ref[h] = qkv[:, base:base + D].astype(vo_ref.dtype)


def qkv_prep(qkv, q_gamma, k_gamma, cos, sin, eps, nh, nkv, D, tt=256):
    """qkv:(T, (nh+2*nkv)*D) -> head-major bf16 q:(nh,T,D), k:(nkv,T,D), v:(nkv,T,D)."""
    T, total = qkv.shape
    tt = _tile(T, tt, 8)
    kern = functools.partial(_qkv_prep_kernel, eps=eps, nh=nh, nkv=nkv, D=D)
    return pl.pallas_call(
        kern,
        grid=(T // tt,),
        in_specs=[pl.BlockSpec((tt, total), lambda i: (i, 0)),
                  pl.BlockSpec((1, D), lambda i: (0, 0)),
                  pl.BlockSpec((1, D), lambda i: (0, 0)),
                  pl.BlockSpec((tt, D), lambda i: (i, 0)),
                  pl.BlockSpec((tt, D), lambda i: (i, 0))],
        out_specs=[pl.BlockSpec((nh, tt, D), lambda i: (0, i, 0)),
                   pl.BlockSpec((nkv, tt, D), lambda i: (0, i, 0)),
                   pl.BlockSpec((nkv, tt, D), lambda i: (0, i, 0))],
        out_shape=[jax.ShapeDtypeStruct((nh, T, D), jnp.bfloat16),
                   jax.ShapeDtypeStruct((nkv, T, D), jnp.bfloat16),
                   jax.ShapeDtypeStruct((nkv, T, D), jnp.bfloat16)],
        compiler_params=_cparams("parallel"),
    )(qkv, q_gamma.reshape(1, D).astype(jnp.float32),
      k_gamma.reshape(1, D).astype(jnp.float32), cos, sin)


# ----------------------------------------------------------------------------
# Flash-style causal GQA attention (online softmax, causal block skipping)
# ----------------------------------------------------------------------------

def _flash_gqa_kernel(q_ref, k_ref, v_ref, o_ref, m_sc, l_sc, acc_sc,
                      *, scale, rep, tq, tk):
    qi = pl.program_id(1)
    kj = pl.program_id(2)

    @pl.when(kj == 0)
    def _():
        m_sc[...] = jnp.full_like(m_sc, -1e30)
        l_sc[...] = jnp.zeros_like(l_sc)
        acc_sc[...] = jnp.zeros_like(acc_sc)

    # causal block skip: kv block is fully masked iff kj*tk > qi*tq + tq - 1
    @pl.when(kj * tk <= qi * tq + (tq - 1))
    def _():
        k = k_ref[0]                                  # (tk, D) bf16, shared by `rep` q heads
        v = v_ref[0]
        row = jax.lax.broadcasted_iota(jnp.int32, (tq, tk), 0) + qi * tq
        col = jax.lax.broadcasted_iota(jnp.int32, (tq, tk), 1) + kj * tk
        mask = col <= row
        for r in range(rep):                          # static unroll over q heads of this kv head
            q = q_ref[r]                              # (tq, D) bf16
            s = jax.lax.dot_general(q, k, (((1,), (1,)), ((), ())),
                                    preferred_element_type=jnp.float32) * scale
            s = jnp.where(mask, s, jnp.float32(-1e30))
            m_prev = m_sc[r]
            m_new = jnp.maximum(m_prev, jnp.max(s, axis=-1, keepdims=True))
            alpha = jnp.exp(m_prev - m_new)
            p = jnp.exp(s - m_new)
            l_sc[r] = alpha * l_sc[r] + jnp.sum(p, axis=-1, keepdims=True)
            acc_sc[r] = alpha * acc_sc[r] + jnp.dot(p.astype(v.dtype), v,
                                                    preferred_element_type=jnp.float32)
            m_sc[r] = m_new

    @pl.when(kj == pl.num_programs(2) - 1)
    def _():
        # exact division (not approx reciprocal) for reference parity
        o_ref[...] = (acc_sc[...] / l_sc[...]).astype(o_ref.dtype)


def flash_gqa_attention(q, k, v, scale, tq=256, tk=256):
    """q:(nh,T,D) k,v:(nkv,T,D) bf16 -> (nh,T,D) bf16 causal attention.
    q head h uses kv head h // rep."""
    nh, T, D = q.shape
    nkv = k.shape[0]
    rep = nh // nkv
    tq, tk = _tile(T, tq, 8), _tile(T, tk, 8)
    kern = functools.partial(_flash_gqa_kernel, scale=scale, rep=rep, tq=tq, tk=tk)
    # TODO(synk): no KV cache / paged attention (vLLM Attention backend); full-seq causal only.
    return pl.pallas_call(
        kern,
        grid=(nkv, T // tq, T // tk),
        in_specs=[pl.BlockSpec((rep, tq, D), lambda h, qi, kj: (h, qi, 0)),
                  pl.BlockSpec((1, tk, D), lambda h, qi, kj: (h, kj, 0)),
                  pl.BlockSpec((1, tk, D), lambda h, qi, kj: (h, kj, 0))],
        out_specs=pl.BlockSpec((rep, tq, D), lambda h, qi, kj: (h, qi, 0)),
        out_shape=jax.ShapeDtypeStruct((nh, T, D), jnp.bfloat16),
        scratch_shapes=[pltpu.VMEM((rep, tq, 1), jnp.float32),
                        pltpu.VMEM((rep, tq, 1), jnp.float32),
                        pltpu.VMEM((rep, tq, D), jnp.float32)],
        compiler_params=_cparams("parallel", "parallel", "arbitrary"),
    )(q, k, v)


# ----------------------------------------------------------------------------
# o_proj (head-blocked K reduction) fused with residual-add + RMSNorm epilogue
# ----------------------------------------------------------------------------

def _oproj_add_norm_kernel(o_ref, w_ref, res_ref, g_ref,
                           y_ref, res_out_ref, acc_ref, *, eps):
    h = pl.program_id(1)

    @pl.when(h == 0)
    def _():
        acc_ref[...] = jnp.zeros_like(acc_ref)

    acc_ref[...] += jnp.dot(o_ref[0], w_ref[0], preferred_element_type=jnp.float32)

    @pl.when(h == pl.num_programs(1) - 1)
    def _():
        s = acc_ref[...] + res_ref[...].astype(jnp.float32)
        res_out_ref[...] = s
        var = jnp.mean(s * s, axis=-1, keepdims=True)
        y_ref[...] = (s * jax.lax.rsqrt(var + eps) * g_ref[...]).astype(y_ref.dtype)


def oproj_add_rmsnorm(o_heads, o_w_heads, residual, gamma, eps, tm=256):
    """(sum_h o[h] @ Wo[h]) + residual -> (rmsnorm(s)*gamma bf16, s f32)."""
    nh, T, D = o_heads.shape
    H = o_w_heads.shape[-1]
    tm = _tile(T, tm, 8)
    return pl.pallas_call(
        functools.partial(_oproj_add_norm_kernel, eps=eps),
        grid=(T // tm, nh),
        in_specs=[pl.BlockSpec((1, tm, D), lambda i, h: (h, i, 0)),
                  pl.BlockSpec((1, D, H), lambda i, h: (h, 0, 0)),
                  pl.BlockSpec((tm, H), lambda i, h: (i, 0)),
                  pl.BlockSpec((1, H), lambda i, h: (0, 0))],
        out_specs=[pl.BlockSpec((tm, H), lambda i, h: (i, 0)),
                   pl.BlockSpec((tm, H), lambda i, h: (i, 0))],
        out_shape=[jax.ShapeDtypeStruct((T, H), jnp.bfloat16),
                   jax.ShapeDtypeStruct((T, H), jnp.float32)],
        scratch_shapes=[pltpu.VMEM((tm, H), jnp.float32)],
        compiler_params=_cparams("parallel", "arbitrary"),
    )(o_heads, o_w_heads.astype(jnp.bfloat16), residual,
      gamma.reshape(1, H).astype(jnp.float32))


# ----------------------------------------------------------------------------
# Fused SiLU MLP (gate/up/act/down) with intermediate-dim tiling, bf16 output
# ----------------------------------------------------------------------------

def _mlp_kernel(x_ref, wg_ref, wu_ref, wd_ref, o_ref, acc_ref):
    t = pl.program_id(1)

    @pl.when(t == 0)
    def _():
        acc_ref[...] = jnp.zeros_like(acc_ref)

    x = x_ref[...]
    g = jnp.dot(x, wg_ref[...], preferred_element_type=jnp.float32)
    u = jnp.dot(x, wu_ref[...], preferred_element_type=jnp.float32)
    act = (g * jax.nn.sigmoid(g) * u).astype(jnp.bfloat16)      # SiluAndMul (f32 VPU math)
    acc_ref[...] += jnp.dot(act, wd_ref[...], preferred_element_type=jnp.float32)

    @pl.when(t == pl.num_programs(1) - 1)
    def _():
        o_ref[...] = acc_ref[...].astype(o_ref.dtype)


def silu_mlp(x, w_gate, w_up, w_down, tm=256, ti=None):
    """Dots1MLP: down( silu(gate(x)) * up(x) ) -> bf16."""
    M, H = x.shape
    I = w_gate.shape[1]
    ti = _hw()["ti"] if ti is None else ti
    tm, ti = _tile(M, tm, 8), _tile(I, ti)
    return pl.pallas_call(
        _mlp_kernel,
        grid=(M // tm, I // ti),
        in_specs=[pl.BlockSpec((tm, H), lambda i, t: (i, 0)),
                  pl.BlockSpec((H, ti), lambda i, t: (0, t)),
                  pl.BlockSpec((H, ti), lambda i, t: (0, t)),
                  pl.BlockSpec((ti, H), lambda i, t: (t, 0))],
        out_specs=pl.BlockSpec((tm, H), lambda i, t: (i, 0)),
        out_shape=jax.ShapeDtypeStruct((M, H), jnp.bfloat16),
        scratch_shapes=[pltpu.VMEM((tm, H), jnp.float32)],
        compiler_params=_cparams("parallel", "arbitrary"),
    )(x.astype(jnp.bfloat16), w_gate.astype(jnp.bfloat16),
      w_up.astype(jnp.bfloat16), w_down.astype(jnp.bfloat16))


# ----------------------------------------------------------------------------
# Sparse fused MoE: scalar-prefetched activity bitmap + expert-weight DMA skip,
# intermediate-dim tiling, VMEM-resident x, weighted accumulation in scratch.
# ----------------------------------------------------------------------------

def _moe_kernel(act_ref, widx_ref, x_ref, rw_ref, eg_ref, eu_ref, ed_ref,
                o_ref, acc_ref, *, scale):
    i = pl.program_id(0)
    e = pl.program_id(1)
    t = pl.program_id(2)
    n_e = pl.num_programs(1)
    n_t = pl.num_programs(2)

    @pl.when(jnp.logical_and(e == 0, t == 0))
    def _():
        acc_ref[...] = jnp.zeros_like(acc_ref)

    # Skip compute entirely for experts no token of this tile routes to.  The
    # weight DMA is also elided: the widx index_map repeats the previous active
    # expert's block index, so the block index does not change on skipped steps.
    @pl.when(act_ref[i, e] > 0)
    def _():
        x = x_ref[...]                                          # (tm, H) bf16, VMEM-resident
        g = jnp.dot(x, eg_ref[0], preferred_element_type=jnp.float32)
        u = jnp.dot(x, eu_ref[0], preferred_element_type=jnp.float32)
        act = (g * jax.nn.sigmoid(g) * u).astype(jnp.bfloat16)
        part = jnp.dot(act, ed_ref[0], preferred_element_type=jnp.float32)
        rw = rw_ref[...]                                        # (tm, E) dense routing weights
        col = jax.lax.broadcasted_iota(jnp.int32, rw.shape, 1)
        w_e = jnp.sum(jnp.where(col == e, rw, 0.0), axis=-1, keepdims=True)
        acc_ref[...] += w_e * part

    @pl.when(jnp.logical_and(e == n_e - 1, t == n_t - 1))
    def _():
        o_ref[...] = (acc_ref[...] * scale).astype(o_ref.dtype)


def fused_moe(x, routing_w, expert_g, expert_u, expert_d, scale, tm=256, ti=None):
    """Weighted sum over *active* experts of silu-MLP(x), scaled by routed_scaling_factor."""
    T, H = x.shape
    E, _, I = expert_g.shape
    ti = _hw()["ti"] if ti is None else ti
    tm, ti = _tile(T, tm, 8), _tile(I, ti)
    n_tiles = T // tm

    # Routing-driven sparsity metadata (tiny, plain JAX).
    rw_tiles = routing_w.reshape(n_tiles, tm, E)
    active = (jnp.max(rw_tiles, axis=1) > 0).astype(jnp.int32)          # (n_tiles, E)

    # Remap inactive steps to the previously used expert -> unchanged block index
    # across consecutive grid steps -> Pallas skips the expert-weight DMA.
    def _carry(prev, ae):
        a, e = ae
        cur = jnp.where(a > 0, e, prev)
        return cur, cur
    e_ids = jnp.tile(jnp.arange(E, dtype=jnp.int32)[None, :], (n_tiles, 1)).reshape(-1)
    _, widx = jax.lax.scan(_carry, jnp.int32(0), (active.reshape(-1), e_ids))
    widx = widx.reshape(n_tiles, E)

    grid_spec = pltpu.PrefetchScalarGridSpec(
        num_scalar_prefetch=2,
        grid=(n_tiles, E, I // ti),
        in_specs=[
            pl.BlockSpec((tm, H), lambda i, e, t, act, wi: (i, 0)),
            pl.BlockSpec((tm, E), lambda i, e, t, act, wi: (i, 0)),
            pl.BlockSpec((1, H, ti), lambda i, e, t, act, wi: (wi[i, e], 0, t)),
            pl.BlockSpec((1, H, ti), lambda i, e, t, act, wi: (wi[i, e], 0, t)),
            pl.BlockSpec((1, ti, H), lambda i, e, t, act, wi: (wi[i, e], t, 0)),
        ],
        out_specs=pl.BlockSpec((tm, H), lambda i, e, t, act, wi: (i, 0)),
        scratch_shapes=[pltpu.VMEM((tm, H), jnp.float32)],
    )
    # TODO(synk): for very large expert counts, a sorted grouped-matmul (megablox-style)
    # layout would further improve MXU utilization over the bitmap-skip scheme.
    return pl.pallas_call(
        functools.partial(_moe_kernel, scale=scale),
        grid_spec=grid_spec,
        out_shape=jax.ShapeDtypeStruct((T, H), jnp.bfloat16),
        compiler_params=_cparams("parallel", "arbitrary", "arbitrary"),
    )(active, widx, x.astype(jnp.bfloat16), routing_w.astype(jnp.float32),
      expert_g.astype(jnp.bfloat16), expert_u.astype(jnp.bfloat16),
      expert_d.astype(jnp.bfloat16))


# ----------------------------------------------------------------------------
# Final fused residual-add + RMSNorm
# ----------------------------------------------------------------------------

def _add_rmsnorm_kernel(x_ref, r_ref, g_ref, o_ref, *, eps):
    s = x_ref[...].astype(jnp.float32) + r_ref[...].astype(jnp.float32)
    var = jnp.mean(s * s, axis=-1, keepdims=True)
    o_ref[...] = (s * jax.lax.rsqrt(var + eps) * g_ref[...]).astype(o_ref.dtype)


def add_rmsnorm(x, residual, gamma, eps, tm=256):
    M, H = x.shape
    tm = _tile(M, tm, 8)
    spec = pl.BlockSpec((tm, H), lambda i: (i, 0))
    return pl.pallas_call(
        functools.partial(_add_rmsnorm_kernel, eps=eps),
        grid=(M // tm,),
        in_specs=[spec, spec, pl.BlockSpec((1, H), lambda i: (0, 0))],
        out_specs=spec,
        out_shape=jax.ShapeDtypeStruct((M, H), jnp.float32),
        compiler_params=_cparams("parallel"),
    )(x, residual, gamma.reshape(1, H).astype(jnp.float32))


# ----------------------------------------------------------------------------
# Plain-JAX glue (RoPE tables, routing, embedding gather)
# ----------------------------------------------------------------------------

def rope_tables(positions, head_dim, theta):
    half = head_dim // 2
    inv_freq = 1.0 / (theta ** (jnp.arange(0, head_dim, 2, dtype=jnp.float32) / head_dim))
    freqs = positions.astype(jnp.float32)[:, None] * inv_freq[None, :]     # (T, half)
    cos_h, sin_h = jnp.cos(freqs), jnp.sin(freqs)
    # full-width tables (duplicated halves); rotate-half sign folded into sin.
    cos = jnp.concatenate([cos_h, cos_h], axis=-1)                         # (T, D)
    sin = jnp.concatenate([-sin_h, sin_h], axis=-1)                        # (T, D)
    return cos, sin


def grouped_topk_weights(logits, cfg):
    """FusedMoE use_grouped_topk (softmax scoring, no correction bias) -> dense (T, E) weights."""
    # TODO(synk): grouped top-k routing kept in plain JAX (small, control-flow heavy).
    T, E = logits.shape
    n_group = cfg["n_group"]
    topk_group = cfg["topk_group"]
    top_k = cfg["num_experts_per_tok"]
    scores = jax.nn.softmax(logits.astype(jnp.float32), axis=-1)
    group_scores = scores.reshape(T, n_group, E // n_group).max(axis=-1)
    _, group_idx = jax.lax.top_k(group_scores, topk_group)
    group_mask = jnp.zeros((T, n_group), jnp.float32).at[
        jnp.arange(T)[:, None], group_idx].set(1.0)
    score_mask = jnp.repeat(group_mask, E // n_group, axis=-1)
    tmp = jnp.where(score_mask > 0, scores, 0.0)
    topk_w, topk_ids = jax.lax.top_k(tmp, top_k)
    if cfg["norm_topk_prob"]:
        topk_w = topk_w / jnp.sum(topk_w, axis=-1, keepdims=True)
    dense = jnp.zeros((T, E), jnp.float32).at[
        jnp.arange(T)[:, None], topk_ids].add(topk_w)
    return dense


# ----------------------------------------------------------------------------
# Model
# ----------------------------------------------------------------------------

CFG = dict(
    vocab_size=128,
    hidden_size=64,
    num_hidden_layers=2,
    num_attention_heads=4,
    num_key_value_heads=2,
    head_dim=16,
    intermediate_size=128,
    moe_intermediate_size=32,
    n_routed_experts=8,
    num_experts_per_tok=2,
    n_group=2,
    topk_group=1,
    n_shared_experts=1,
    routed_scaling_factor=2.5,
    norm_topk_prob=True,
    first_k_dense_replace=1,
    moe_layer_freq=1,
    rms_norm_eps=1e-6,
    rope_theta=10000.0,
    attention_bias=False,   # dots.llm1 uses no attention bias
)


def init_params(key, cfg):
    H = cfg["hidden_size"]
    nh = cfg["num_attention_heads"]
    nkv = cfg["num_key_value_heads"]
    D = cfg["head_dim"]
    q_size, kv_size = nh * D, nkv * D
    E = cfg["n_routed_experts"]
    I_dense = cfg["intermediate_size"]
    I_moe = cfg["moe_intermediate_size"]
    I_shared = I_moe * cfg["n_shared_experts"]

    def w(k, shape, scale=0.02, dtype=jnp.bfloat16):
        return (scale * jax.random.normal(k, shape, dtype=jnp.float32)).astype(dtype)

    keys = iter(jax.random.split(key, 160))
    params = dict(
        embed=w(next(keys), (cfg["vocab_size"], H), 1.0, jnp.bfloat16),
        final_norm=jnp.ones((H,), jnp.float32) + 0.01 * jax.random.normal(next(keys), (H,)),
        layers=[],
    )
    for li in range(cfg["num_hidden_layers"]):
        is_moe = (li >= cfg["first_k_dense_replace"] and li % cfg["moe_layer_freq"] == 0)
        lp = dict(
            input_ln=jnp.ones((H,), jnp.float32) + 0.01 * jax.random.normal(next(keys), (H,)),
            post_ln=jnp.ones((H,), jnp.float32) + 0.01 * jax.random.normal(next(keys), (H,)),
            q_norm=jnp.ones((D,), jnp.float32) + 0.01 * jax.random.normal(next(keys), (D,)),
            k_norm=jnp.ones((D,), jnp.float32) + 0.01 * jax.random.normal(next(keys), (D,)),
            qkv_w=w(next(keys), (H, q_size + 2 * kv_size)),
            o_w=w(next(keys), (q_size, H)),
        )
        if is_moe:
            lp["gate_w"] = w(next(keys), (H, E))
            lp["expert_g"] = w(next(keys), (E, H, I_moe))
            lp["expert_u"] = w(next(keys), (E, H, I_moe))
            lp["expert_down"] = w(next(keys), (E, I_moe, H))
            lp["shared_g"] = w(next(keys), (H, I_shared))
            lp["shared_u"] = w(next(keys), (H, I_shared))
            lp["shared_down"] = w(next(keys), (I_shared, H))
        else:
            lp["mlp_g"] = w(next(keys), (H, I_dense))
            lp["mlp_u"] = w(next(keys), (H, I_dense))
            lp["mlp_down"] = w(next(keys), (I_dense, H))
        lp["is_moe"] = is_moe
        params["layers"].append(lp)
    return params


def attention_block(hidden, residual, cos, sin, lp, cfg):
    nh = cfg["num_attention_heads"]
    nkv = cfg["num_key_value_heads"]
    D = cfg["head_dim"]
    H = cfg["hidden_size"]
    eps = cfg["rms_norm_eps"]

    # fused: residual-add + input RMSNorm prologue + qkv projection (bf16 out)
    qkv, residual = add_rmsnorm_matmul(hidden, residual, lp["input_ln"], lp["qkv_w"], eps)
    # fused per-head q/k RMSNorm + Neox RoPE + head-major transpose (+ v passthrough)
    qh, kh, vh = qkv_prep(qkv, lp["q_norm"], lp["k_norm"], cos, sin, eps, nh, nkv, D)
    # flash-style causal GQA attention (online softmax, block skipping)
    o = flash_gqa_attention(qh, kh, vh, float(D) ** -0.5)               # (nh, T, D) bf16
    # o_proj (head axis as K reduction) fused with residual-add + post-attn RMSNorm
    o_w_heads = lp["o_w"].reshape(nh, D, H)
    hidden, residual = oproj_add_rmsnorm(o, o_w_heads, residual, lp["post_ln"], eps)
    return hidden, residual


def moe_block(x, valid, lp, cfg):
    shared = silu_mlp(x, lp["shared_g"], lp["shared_u"], lp["shared_down"])
    logits = linear(x, lp["gate_w"], out_dtype=jnp.float32)
    routing_w = grouped_topk_weights(logits, cfg) * valid               # zero padded tokens
    routed = fused_moe(x, routing_w, lp["expert_g"], lp["expert_u"], lp["expert_down"],
                       cfg["routed_scaling_factor"])
    return routed + shared


def decoder_layer(hidden, residual, cos, sin, valid, lp, cfg):
    hidden, residual = attention_block(hidden, residual, cos, sin, lp, cfg)
    if lp["is_moe"]:
        hidden = moe_block(hidden, valid, lp, cfg)
    else:
        hidden = silu_mlp(hidden, lp["mlp_g"], lp["mlp_u"], lp["mlp_down"])
    return hidden, residual


def dots1_model_forward(input_ids, positions, params, cfg):
    T = input_ids.shape[0]
    # pad the token dim so every kernel tiles cleanly (no single-huge-block fallback)
    T_pad = _round_up(T, 8) if T <= 128 else _round_up(T, 128)
    ids = jnp.pad(input_ids, (0, T_pad - T))
    pos = jnp.pad(positions, (0, T_pad - T))
    valid = (jnp.arange(T_pad) < T).astype(jnp.float32)[:, None]

    # TODO(synk): embedding gather kept in plain JAX (no matmul hot path).
    hidden = params["embed"][ids]                                       # (T_pad, H) bf16
    residual = jnp.zeros((T_pad, cfg["hidden_size"]), jnp.float32)
    cos, sin = rope_tables(pos, cfg["head_dim"], cfg["rope_theta"])
    for lp in params["layers"]:
        hidden, residual = decoder_layer(hidden, residual, cos, sin, valid, lp, cfg)
    out = add_rmsnorm(hidden, residual, params["final_norm"], cfg["rms_norm_eps"])
    return out[:T]


# ----------------------------------------------------------------------------
# Main
# ----------------------------------------------------------------------------

if __name__ == "__main__":
    key = jax.random.PRNGKey(0)
    pkey, ikey = jax.random.split(key)
    params = init_params(pkey, CFG)

    T = 8
    input_ids = jax.random.randint(ikey, (T,), 0, CFG["vocab_size"], dtype=jnp.int32)
    positions = jnp.arange(T, dtype=jnp.int32)

    out = dots1_model_forward(input_ids, positions, params, CFG)
    out = jax.block_until_ready(out)

    assert out.shape == (T, CFG["hidden_size"])
    assert bool(jnp.all(jnp.isfinite(out)))
    print("KERNEL_OK")
</pallas_src>

<mosaic_0001>
module attributes {stable_mosaic.version = 11 : i64} {
  func.func @_add_norm_matmul_kernel(%arg0: i32, %arg1: i32, %arg2: memref<8x64xbf16, #tpu.memory_space<vmem>>, %arg3: memref<8x64xf32, #tpu.memory_space<vmem>>, %arg4: memref<1x64xf32, #tpu.memory_space<vmem>>, %arg5: memref<64x128xbf16, #tpu.memory_space<vmem>>, %arg6: memref<8x128xbf16, #tpu.memory_space<vmem>>, %arg7: memref<8x64xf32, #tpu.memory_space<vmem>>, %arg8: memref<8x64xbf16, #tpu.memory_space<vmem>>) attributes {dimension_semantics = [#tpu.dimension_semantics<parallel>, #tpu.dimension_semantics<arbitrary>], iteration_bounds = array<i64: 1, 1>, scalar_prefetch = 0 : i64, scratch_operands = 1 : i64, tpu.core_type = #tpu.core_type<tc>, window_params = [{transform_indices = @transform_0, window_bounds = array<i64: 8, 64>}, {transform_indices = @transform_1, window_bounds = array<i64: 8, 64>}, {pipeline_mode = #tpu.pipeline_mode<synchronous>, transform_indices = @transform_2, window_bounds = array<i64: 1, 64>}, {transform_indices = @transform_3, window_bounds = array<i64: 64, 128>}, {transform_indices = @transform_4, window_bounds = array<i64: 8, 128>}, {transform_indices = @transform_5, window_bounds = array<i64: 8, 64>}]} {
    %c0_i32 = arith.constant 0 : i32
    %0 = arith.cmpi eq, %arg1, %c0_i32 : i32
    %1 = arith.extui %0 : i1 to i32
    %c0_i32_0 = arith.constant 0 : i32
    %2 = arith.cmpi ne, %1, %c0_i32_0 : i32
    scf.if %2 {
      %c0_6 = arith.constant 0 : index
      %c0_7 = arith.constant 0 : index
      %8 = vector.load %arg2[%c0_6, %c0_7] : memref<8x64xbf16, #tpu.memory_space<vmem>>, vector<8x64xbf16>
      %9 = arith.extf %8 : vector<8x64xbf16> to vector<8x64xf32>
      %c0_8 = arith.constant 0 : index
      %c0_9 = arith.constant 0 : index
      %10 = vector.load %arg3[%c0_8, %c0_9] : memref<8x64xf32, #tpu.memory_space<vmem>>, vector<8x64xf32>
      %11 = arith.addf %9, %10 : vector<8x64xf32>
      %c0_10 = arith.constant 0 : index
      %c0_11 = arith.constant 0 : index
      %12 = vector.load %arg7[%c0_10, %c0_11] : memref<8x64xf32, #tpu.memory_space<vmem>>, vector<8x64xf32>
      tpu.vector_store %arg7[%c0_10, %c0_11], %11 {strides = array<i32>} : memref<8x64xf32, #tpu.memory_space<vmem>>, vector<8x64xf32>,
      %13 = arith.mulf %11, %11 : vector<8x64xf32>
      %cst_12 = arith.constant dense<0.000000e+00> : vector<8xf32>
      %14 = vector.multi_reduction <add>, %13, %cst_12 [1] : vector<8x64xf32> to vector<8xf32>
      %15 = vector.shape_cast %14 : vector<8xf32> to vector<8x1xf32>
      %cst_13 = arith.constant 6.400000e+01 : f32
      %16 = vector.broadcast %cst_13 : f32 to vector<8x1xf32>
      %17 = arith.divf %15, %16 : vector<8x1xf32>
      %cst_14 = arith.constant 9.99999997E-7 : f32
      %18 = vector.broadcast %cst_14 : f32 to vector<8x1xf32>
      %19 = arith.addf %17, %18 : vector<8x1xf32>
      %20 = math.rsqrt %19 : vector<8x1xf32>
      %21 = vector.broadcast %20 : vector<8x1xf32> to vector<8x64xf32>
      %22 = arith.mulf %11, %21 : vector<8x64xf32>
      %c0_15 = arith.constant 0 : index
      %c0_16 = arith.constant 0 : index
      %23 = vector.load %arg4[%c0_15, %c0_16] : memref<1x64xf32, #tpu.memory_space<vmem>>, vector<1x64xf32>
      %24 = vector.broadcast %23 : vector<1x64xf32> to vector<8x64xf32>
      %25 = arith.mulf %22, %24 : vector<8x64xf32>
      %26 = arith.truncf %25 : vector<8x64xf32> to vector<8x64xbf16>
      %c0_17 = arith.constant 0 : index
      %c0_18 = arith.constant 0 : index
      %27 = vector.load %arg8[%c0_17, %c0_18] : memref<8x64xbf16, #tpu.memory_space<vmem>>, vector<8x64xbf16>
      tpu.vector_store %arg8[%c0_17, %c0_18], %26 {strides = array<i32>} : memref<8x64xbf16, #tpu.memory_space<vmem>>, vector<8x64xbf16>,
    } else {
    }
    %c0 = arith.constant 0 : index
    %c0_1 = arith.constant 0 : index
    %3 = vector.load %arg8[%c0, %c0_1] : memref<8x64xbf16, #tpu.memory_space<vmem>>, vector<8x64xbf16>
    %c0_2 = arith.constant 0 : index
    %c0_3 = arith.constant 0 : index
    %4 = vector.load %arg5[%c0_2, %c0_3] : memref<64x128xbf16, #tpu.memory_space<vmem>>, vector<64x128xbf16>
    %cst = arith.constant dense<0.000000e+00> : vector<8x128xf32>
    %5 = tpu.matmul %3, %4, %cst {dimension_numbers = #tpu.dot_dimension_numbers<[1], [0], [0], [1], [0, 0, 1, 1], [], []>} : vector<8x64xbf16>, vector<64x128xbf16>, vector<8x128xf32> -> vector<8x128xf32>
    %6 = arith.truncf %5 : vector<8x128xf32> to vector<8x128xbf16>
    %c0_4 = arith.constant 0 : index
    %c0_5 = arith.constant 0 : index
    %7 = vector.load %arg6[%c0_4, %c0_5] : memref<8x128xbf16, #tpu.memory_space<vmem>>, vector<8x128xbf16>
    tpu.vector_store %arg6[%c0_4, %c0_5], %6 {strides = array<i32>} : memref<8x128xbf16, #tpu.memory_space<vmem>>, vector<8x128xbf16>,
    return
  }
  func.func @transform_0(%arg0: i32, %arg1: i32) -> (i32, i32) {
    %c0_i32 = arith.constant 0 : i32
    %c0_i32_0 = arith.constant 0 : i32
    return %arg0, %c0_i32 : i32, i32
  }
  func.func @transform_1(%arg0: i32, %arg1: i32) -> (i32, i32) {
    %c0_i32 = arith.constant 0 : i32
    %c0_i32_0 = arith.constant 0 : i32
    return %arg0, %c0_i32 : i32, i32
  }
  func.func @transform_2(%arg0: i32, %arg1: i32) -> (i32, i32) {
    %c0_i32 = arith.constant 0 : i32
    %c0_i32_0 = arith.constant 0 : i32
    %c0_i32_1 = arith.constant 0 : i32
    return %c0_i32, %c0_i32_0 : i32, i32
  }
  func.func @transform_3(%arg0: i32, %arg1: i32) -> (i32, i32) {
    %c0_i32 = arith.constant 0 : i32
    %c0_i32_0 = arith.constant 0 : i32
    return %c0_i32, %arg1 : i32, i32
  }
  func.func @transform_4(%arg0: i32, %arg1: i32) -> (i32, i32) {
    %c0_i32 = arith.constant 0 : i32
    return %arg0, %arg1 : i32, i32
  }
  func.func @transform_5(%arg0: i32, %arg1: i32) -> (i32, i32) {
    %c0_i32 = arith.constant 0 : i32
    %c0_i32_0 = arith.constant 0 : i32
    return %arg0, %c0_i32 : i32, i32
  }
}

</mosaic_0001>

<bundles_post_ra>
// kernel: tpu_custom_call.1
= control target key start
LH: loop header
LB: loop body
LE: loop exit
PB: predicated region body
PF: predicated region fallthrough
CT: control target
= control target key end

     0   :  { %11 = vsyncpa [#allocation4], 0  ;;  %s459_s0 = inlined_call_operand.hbm [shape: bf16[8,64], index: 0, kind: input, shape index: {}]   ;;  %s460_s1 = inlined_call_operand.hbm [shape: f32[8,64], index: 1, kind: input, shape index: {}]   ;;  %s461_s2 = inlined_call_operand.vmem [shape: f32[1,64], index: 2, kind: input, shape index: {}]   ;;  %s462_s3 = inlined_call_operand.hbm [shape: bf16[64,128], index: 3, kind: input, shape index: {}]   ;;  %s463_s4 = inlined_call_operand.hbm [shape: bf16[8,128], index: 4, kind: output, shape index: {0}]   ;;  %s464_s5 = inlined_call_operand.hbm [shape: f32[8,64], index: 5, kind: output, shape index: {1}]  }
   0x1   :  { %12 = vsyncpa [#allocation7], 0 }
   0x2   :  { %13 = vsyncpa [#allocation5], 0 }
   0x3   :  { %14 = vsyncpa [#allocation11], 0  ;;  %s354_s18 = smov [#allocation6]   ;;  %s355_s20 = smov [#allocation3]  }
   0x4   :  { %s31_s19 = sshll.u32 %s354_s18, 4  ;;  %s21_s21 = sshll.u32 %s355_s20, 4  ;;  %s32_s19 = int_to_ptr.vmem [resolvable:$true] %s31_s19  ;;  %s22_s21 = int_to_ptr.vmem [resolvable:$true] %s21_s21 }
   0x5   :  { %s236_s24 = scalar_lea.hbm %s460_s1, 128 }
   0x6   :  { %p237_p0 = scmp.ne.s32.totalorder %s460_s1, %s236_s24  ;;  %p240_p1 = scmp.lt.u32.totalorder %s236_s24, %s460_s1 }
   0x8   :  { %p242_p2 = pnand %p240_p1, %p237_p0 }
   0xa   :  { %245 = shalt.err (!%p242_p2)
}
   0xb   :  { %s246_s29 = scalar_lea.vmem %s32_s19, 128  ;;  %p251_p4 = scmp.lt.s32.totalorder %s32_s19, %s32_s19 }
   0xc   :  { %p247_p3 = scmp.ne.s32.totalorder %s32_s19, %s246_s29  ;;  %p252_p5 = scmp.lt.s32.totalorder %s246_s29, %s246_s29 }
   0xe   :  { %p253_p6 = por %p252_p5, %p251_p4 }
  0x10   :  { %p254_p7 = pnand %p253_p6, %p247_p3 }
  0x12   :  { %257 = shalt.err (!%p254_p7)
}
  0x13   :  { %34 = dma.hbm_to_vmem [thread:$0]  %s460_s1, 128, %s32_s19, [#allocation7]  }
  0x14   :  { %s258_s9 = scalar_lea.hbm %s459_s0, 64 }
  0x15   :  { %p259_p8 = scmp.ne.s32.totalorder %s459_s0, %s258_s9  ;;  %p262_p9 = scmp.lt.u32.totalorder %s258_s9, %s459_s0 }
  0x17   :  { %p264_p10 = pnand %p262_p9, %p259_p8 }
  0x19   :  { %267 = shalt.err (!%p264_p10)
}
  0x1a   :  { %s268_s14 = scalar_lea.vmem %s22_s21, 64  ;;  %p273_p12 = scmp.lt.s32.totalorder %s22_s21, %s22_s21 }
  0x1b   :  { %p269_p11 = scmp.ne.s32.totalorder %s22_s21, %s268_s14  ;;  %p274_p13 = scmp.lt.s32.totalorder %s268_s14, %s268_s14 }
  0x1d   :  { %p275_p0 = por %p274_p13, %p273_p12 }
  0x1f   :  { %p276_p1 = pnand %p275_p0, %p269_p11 }
  0x21   :  { %279 = shalt.err (!%p276_p1)
}
  0x22   :  { %24 = dma.hbm_to_vmem [thread:$0]  %s459_s0, 64, %s22_s21, [#allocation4]  }
  0x23   :  { %s356_s16 = smov [#allocation8]   ;;  %s280_s20 = scalar_lea.hbm %s462_s3, 512 }
  0x24   :  { %s42_s17 = sshll.u32 %s356_s16, 4  ;;  %p281_p2 = scmp.ne.s32.totalorder %s462_s3, %s280_s20  ;;  %s43_s17 = int_to_ptr.vmem [resolvable:$true] %s42_s17 }
  0x25   :  { %p284_p3 = scmp.lt.u32.totalorder %s280_s20, %s462_s3 }
  0x27   :  { %p286_p4 = pnand %p284_p3, %p281_p2 }
  0x29   :  { %289 = shalt.err (!%p286_p4)
}
  0x2a   :  { %s290_s26 = scalar_lea.vmem %s43_s17, 512  ;;  %p295_p6 = scmp.lt.s32.totalorder %s43_s17, %s43_s17 }
  0x2b   :  { %p291_p5 = scmp.ne.s32.totalorder %s43_s17, %s290_s26  ;;  %p296_p7 = scmp.lt.s32.totalorder %s290_s26, %s290_s26 }
  0x2d   :  { %p297_p8 = por %p296_p7, %p295_p6 }
  0x2f   :  { %p298_p9 = pnand %p297_p8, %p291_p5 }
  0x31   :  { %301 = shalt.err (!%p298_p9)
}
  0x32   :  { %s357_s0 = smov 64   ;;  %s358_s21 = smov 4  }
  0x33   :  { %48 = dma.hbm_to_vmem [thread:$0]  %s462_s3, 512, %s43_s17, [#allocation7], %s357_s0, %s357_s0, %s358_s21  }
  0x34   :  { %346 = dma.done.wait [#allocation4], 64  }
  0x35   :  { %347 = vsyncadd [#allocation4], 4294967232 }
  0x36   :  { %348 = dma.done.wait [#allocation7], 640  }
  0x37   :  { %349 = vsyncadd [#allocation7], 4294966656  ;;  %v63_v0 = vld [vmem:[#allocation3] sm:$0xf]  ;;  %v65_v1 = vld [vmem:[#allocation6] sm:$0xff]  ;;  %vm67_vm0 = vcmask 523264  }
  0x38   :  { %v64_v2 = vunpack.c.l.bf16 %v63_v0  ;;  %v230_v6 = vld [vmem:[#allocation8] sm:$0xff]   ;;  %v359_v7 = vmov 0.0   ;;  %v231_v8 = vld [vmem:[#allocation8 + $0x8] sm:$0xff]   ;;  %v232_v9 = vld [vmem:[#allocation8 + $0x10] sm:$0xff]   ;;  %vm360_vm1 = vmmov 0   ;;  %vm87_vm2 = vcmask 519168  }
  0x39   :  { %209 = vmatprep.subr.bf16.mxu0 %v359_v7  ;;  %v233_v10 = vld [vmem:[#allocation8 + $0x18] sm:$0xff]   ;;  %217 = vmatprep.mubr.msk.bf16.mxu0 %vm360_vm1, %v359_v7  ;;  %v198_v15 = vld [vmem:[%s461_s2] ss:$0 sm:$0xff]  ;;  %s361_s30 = smov [#allocation10]  }
  0x3a   :  { %v66_v3 = vadd.f32 %v65_v1, %v64_v2  ;;  %210 = vmatpush3.bf16.msra.mxu0 %v230_v6  ;;  %s184_s6 = sshll.u32 %s361_s30, 4  ;;  %s185_s6 = int_to_ptr.vmem [resolvable:$true] %s184_s6 }
  0x3b   :  { %211 = vmatprep.subr.bf16.mxu0 %v359_v7  ;;  %s302_s7 = scalar_lea.vmem %s185_s6, 128  ;;  %p307_p11 = scmp.lt.s32.totalorder %s185_s6, %s185_s6 }
  0x3c   :  { %v69_v4 = vmul.f32 %v66_v3, %v66_v3  ;;  %68 = vst.msk [vmem:[#allocation10] sm:$0xff] %vm67_vm0, %v66_v3  ;;  %p303_p10 = scmp.ne.s32.totalorder %s185_s6, %s302_s7  ;;  %p308_p12 = scmp.lt.s32.totalorder %s302_s7, %s302_s7 }
  0x3e   :  { %v70_v5 = vsel %vm67_vm0, %v69_v4, 0.0  ;;  %212 = vmatpush3.bf16.msra.mxu0 %v231_v8  ;;  %p309_p13 = por %p308_p12, %p307_p11 }
  0x3f   :  { %71 = vadd.xlane.f32.xlu0 %v70_v5  ;;  %213 = vmatprep.subr.bf16.mxu0 %v359_v7 }
  0x40   :  { %p310_p0 = pnand %p309_p13, %p303_p10 }
  0x42   :  { %214 = vmatpush3.bf16.msra.mxu0 %v232_v9 }
  0x43   :  { %215 = vmatprep.subr.bf16.mxu0 %v359_v7 }
  0x46   :  { %216 = vmatpush3.bf16.msra.mxu0 %v233_v10 }
  0xcc   :  { %v72_v11 = vpop.xlane.xlu0 %71 }
  0xcd   :  { %v74_v12 = vmul.f32 0.015625, %v72_v11 }
  0xcf   :  { %v75_v13 = vadd.f32 1e-06, %v74_v12 }
  0xd1   :  { %234 = vrsqrt.f32 %v75_v13 }
  0xdb   :  { %v235_v14 = vpop.eup %234 }
  0xdc   :  { %v77_v16 = vmul.f32 %v235_v14, %v66_v3 }
  0xde   :  { %v85_v17 = vmul.f32 %v198_v15, %v77_v16 }
  0xe0   :  { %v86_v18 = vpack.c.bf16 %v85_v17, %v85_v17 }
  0xe2   :  { %88 = vst.msk [vmem:[#allocation2] sm:$0xf] %vm87_vm2, %v86_v18 }
  0xe9   :  { %v89_v19 = vld [vmem:[#allocation2] sm:$0xf] }
  0xea   :  { %218 = vmatmul.mubr.msk.bf16.vlgmr.msra.gmra.mrb[0].mxu0 %vm67_vm0, %v89_v19 }
  0xeb   :  { %313 = shalt.err (!%p310_p0)
}
  0xec   :  { %s314_s9 = scalar_lea.hbm %s464_s5, 128 }
  0xed   :  { %p315_p1 = scmp.ne.s32.totalorder %s464_s5, %s314_s9  ;;  %p318_p2 = scmp.lt.u32.totalorder %s314_s9, %s464_s5 }
  0xef   :  { %p320_p3 = pnand %p318_p2, %p315_p1 }
  0xf1   :  { %323 = shalt.err (!%p320_p3)
}
  0xf2   :  { %187 = dma.vmem_to_hbm [thread:$0]  %s185_s6, 128, %s464_s5, [#allocation11]  }
  0xf3   :  { %s362_s15 = smov [#allocation9]  }
  0xf4   :  { %s174_s16 = sshll.u32 %s362_s15, 4  ;;  %s175_s16 = int_to_ptr.vmem [resolvable:$true] %s174_s16 }
  0xf5   :  { %s324_s17 = scalar_lea.vmem %s175_s16, 64  ;;  %p329_p5 = scmp.lt.s32.totalorder %s175_s16, %s175_s16 }
  0xf6   :  { %p325_p4 = scmp.ne.s32.totalorder %s175_s16, %s324_s17  ;;  %p330_p6 = scmp.lt.s32.totalorder %s324_s17, %s324_s17 }
  0xf8   :  { %p331_p7 = por %p330_p6, %p329_p5 }
  0xfa   :  { %p332_p8 = pnand %p331_p7, %p325_p4 }
 0x1bd   :  { %v160_v20 = vpop.f32.mrb[0].mxu0 }
 0x1be   :  { %v166_v21 = vpack.c.bf16 %v160_v20, %v160_v20  ;;  %v219_v22 = vpop.f32.mrb[1].mxu0 }
 0x1bf   :  { %v163_v23 = vpop.f32.mrb[2].mxu0 }
 0x1c0   :  { %167 = vst [vmem:[#allocation9] sm:$0xf] %v166_v21  ;;  %v220_v24 = vpop.f32.mrb[3].mxu0 }
 0x1c1   :  { %335 = shalt.err (!%p332_p8)
}
 0x1c2   :  { %s336_s5 = scalar_lea.hbm %s463_s4, 64 }
 0x1c3   :  { %p337_p9 = scmp.ne.s32.totalorder %s463_s4, %s336_s5  ;;  %p340_p10 = scmp.lt.u32.totalorder %s336_s5, %s463_s4 }
 0x1c5   :  { %p342_p11 = pnand %p340_p10, %p337_p9 }
 0x1c7   :  { %345 = shalt.err (!%p342_p11)
}
 0x1c8   :  { %177 = dma.vmem_to_hbm [thread:$0]  %s175_s16, 64, %s463_s4, [#allocation5]  }
 0x1c9   :  { %350 = dma.done.wait [#allocation5], 64  }
 0x1ca   :  { %351 = vsyncadd [#allocation5], 4294967232 }
 0x1cb   :  { %352 = dma.done.wait [#allocation11], 128  }
 0x1cc   :  { %353 = vsyncadd [#allocation11], 4294967168 }
 0x1cd   :  { %194 = vsyncpa [#allocation4], 1 }
 0x1ce   :  { %195 = vsyncpa [#allocation7], 1 }
 0x1cf   :  { %196 = vsyncpa [#allocation5], 1 }
 0x1d0   :  { %197 = vsyncpa [#allocation11], 1 }

</bundles_post_ra>
